<compile_context>
chip_gen: v7x
topology: tpu7x:2x2x1
jax: 0.10.0
libtpu: 0.0.40
codegen_flags: <defaults>
</compile_context>

<pallas_src>
import functools

import jax
import jax.numpy as jnp
from jax.experimental import pallas as pl
from jax.experimental.pallas import tpu as pltpu

LANE = 128       # lane width (last dim of every tile)
BR_MAX = 2048    # max sublane rows per block -> 2048*128*4B = 1 MiB f32 tile


def _dice_partial_kernel(x_ref, t_ref, out_ref, *, n_total, br):
    """Per-block partial sums for the dice coefficient.

    Writes [sum(sigmoid(x)*t), sum(sigmoid(x)), sum(t)] for this block as
    three (8, 128) vector partials (reduced with pure VPU adds; the final
    cross-lane collapse happens outside the kernel).
    """
    i = pl.program_id(0)

    x = x_ref[...].astype(jnp.float32)
    t = t_ref[...].astype(jnp.float32)
    s = jax.nn.sigmoid(x)

    # Mask the ragged tail (wrapper lane-pad + Pallas partial-block padding).
    # Statically skipped when the flat length is an exact multiple of a block.
    if n_total % (br * LANE) != 0:
        row = jax.lax.broadcasted_iota(jnp.int32, (br, LANE), 0)
        lane = jax.lax.broadcasted_iota(jnp.int32, (br, LANE), 1)
        idx = (i * br + row) * LANE + lane
        valid = idx < n_total
        s = jnp.where(valid, s, 0.0)
        t = jnp.where(valid, t, 0.0)

    s3 = s.reshape(br // 8, 8, LANE)
    t3 = t.reshape(br // 8, 8, LANE)
    out_ref[0, 0, :, :] = jnp.sum(s3 * t3, axis=0)   # intersection partial
    out_ref[0, 1, :, :] = jnp.sum(s3, axis=0)        # sum(sigmoid(x)) partial
    out_ref[0, 2, :, :] = jnp.sum(t3, axis=0)        # sum(targets) partial


def dice_loss(inputs, targets, smooth=1e-5):
    """Pallas implementation of DiceLoss.forward(inputs, targets)."""
    x = inputs.reshape(-1)
    t = targets.reshape(-1)
    n = x.shape[0]

    # Only pad (by < 128 elements) when the flat length isn't lane-aligned;
    # padded elements are masked out inside the kernel, so the pad value is
    # irrelevant.  No full-array pad / dtype cast passes over HBM.
    rem = n % LANE
    if rem:
        x = jnp.pad(x, (0, LANE - rem))
        t = jnp.pad(t, (0, LANE - rem))
    rows = x.shape[0] // LANE
    x2 = x.reshape(rows, LANE)
    t2 = t.reshape(rows, LANE)

    br = min(BR_MAX, ((rows + 7) // 8) * 8)
    num_blocks = pl.cdiv(rows, br)

    partials = pl.pallas_call(
        functools.partial(_dice_partial_kernel, n_total=n, br=br),
        out_shape=jax.ShapeDtypeStruct((num_blocks, 3, 8, LANE), jnp.float32),
        grid_spec=pltpu.PrefetchScalarGridSpec(
            num_scalar_prefetch=0,
            grid=(num_blocks,),
            in_specs=[
                pl.BlockSpec((br, LANE), lambda i: (i, 0)),
                pl.BlockSpec((br, LANE), lambda i: (i, 0)),
            ],
            out_specs=pl.BlockSpec((1, 3, 8, LANE), lambda i: (i, 0, 0, 0)),
        ),
        compiler_params=pltpu.CompilerParams(
            dimension_semantics=("parallel",),
            vmem_limit_bytes=32 * 1024 * 1024,
        ),
    )(x2, t2)

    sums = jnp.sum(partials, axis=(0, 2, 3))          # -> (3,) f32
    intersection, s_sum, t_sum = sums[0], sums[1], sums[2]
    dice = (2.0 * intersection + smooth) / (s_sum + t_sum + smooth)
    return 1.0 - dice


def dice_loss_ref(inputs, targets, smooth=1e-5):
    s = jax.nn.sigmoid(inputs.reshape(-1).astype(jnp.float32))
    t = targets.reshape(-1).astype(jnp.float32)
    inter = jnp.sum(s * t)
    dice = (2.0 * inter + smooth) / (jnp.sum(s) + jnp.sum(t) + smooth)
    return 1.0 - dice


if __name__ == "__main__":
    key = jax.random.PRNGKey(0)
    k1, k2, k3, k4 = jax.random.split(key, 4)

    # Test 1: typical segmentation-style aligned shape (N, C, H, W).
    inputs = jax.random.normal(k1, (2, 4, 16, 16), dtype=jnp.float32)
    targets = (jax.random.uniform(k2, (2, 4, 16, 16)) > 0.5).astype(jnp.float32)
    loss = jax.block_until_ready(dice_loss(inputs, targets))
    ref = dice_loss_ref(inputs, targets)
    assert jnp.allclose(loss, ref, rtol=1e-5, atol=1e-6), (loss, ref)

    # Test 2: non-lane-aligned flat length exercises the in-kernel tail mask.
    inputs2 = jax.random.normal(k3, (3, 5, 7, 9), dtype=jnp.float32)
    targets2 = (jax.random.uniform(k4, (3, 5, 7, 9)) > 0.5).astype(jnp.float32)
    loss2 = jax.block_until_ready(dice_loss(inputs2, targets2))
    ref2 = dice_loss_ref(inputs2, targets2)
    assert jnp.allclose(loss2, ref2, rtol=1e-5, atol=1e-6), (loss2, ref2)

    print("KERNEL_OK")
</pallas_src>

<mosaic_0001>
module attributes {stable_mosaic.version = 11 : i64} {
  func.func @_dice_partial_kernel(%arg0: i32, %arg1: memref<16x128xf32, #tpu.memory_space<vmem>>, %arg2: memref<16x128xf32, #tpu.memory_space<vmem>>, %arg3: memref<1x3x8x128xf32, #tpu.memory_space<vmem>>) attributes {dimension_semantics = [#tpu.dimension_semantics<parallel>], iteration_bounds = array<i64: 1>, scalar_prefetch = 0 : i64, scratch_operands = 0 : i64, tpu.core_type = #tpu.core_type<tc>, window_params = [{transform_indices = @transform_0, window_bounds = array<i64: 16, 128>}, {transform_indices = @transform_1, window_bounds = array<i64: 16, 128>}, {transform_indices = @transform_2, window_bounds = array<i64: 1, 3, 8, 128>}]} {
    %c0 = arith.constant 0 : index
    %c0_0 = arith.constant 0 : index
    %0 = vector.load %arg1[%c0, %c0_0] : memref<16x128xf32, #tpu.memory_space<vmem>>, vector<16x128xf32>
    %c0_1 = arith.constant 0 : index
    %c0_2 = arith.constant 0 : index
    %1 = vector.load %arg2[%c0_1, %c0_2] : memref<16x128xf32, #tpu.memory_space<vmem>>, vector<16x128xf32>
    %2 = arith.negf %0 : vector<16x128xf32>
    %3 = math.exp %2 : vector<16x128xf32>
    %cst = arith.constant 1.000000e+00 : f32
    %4 = vector.broadcast %cst : f32 to vector<16x128xf32>
    %5 = arith.addf %4, %3 : vector<16x128xf32>
    %6 = arith.divf %4, %5 : vector<16x128xf32>
    %7 = vector.shape_cast %6 : vector<16x128xf32> to vector<2x8x128xf32>
    %8 = vector.shape_cast %1 : vector<16x128xf32> to vector<2x8x128xf32>
    %9 = arith.mulf %7, %8 : vector<2x8x128xf32>
    %cst_3 = arith.constant dense<0.000000e+00> : vector<8x128xf32>
    %10 = vector.multi_reduction <add>, %9, %cst_3 [0] : vector<2x8x128xf32> to vector<8x128xf32>
    %c0_4 = arith.constant 0 : index
    %c0_5 = arith.constant 0 : index
    %c0_6 = arith.constant 0 : index
    %c0_7 = arith.constant 0 : index
    %11 = vector.load %arg3[%c0_4, %c0_5, %c0_6, %c0_7] : memref<1x3x8x128xf32, #tpu.memory_space<vmem>>, vector<1x1x8x128xf32>
    %12 = vector.shape_cast %11 : vector<1x1x8x128xf32> to vector<8x128xf32>
    %13 = vector.shape_cast %10 : vector<8x128xf32> to vector<1x1x8x128xf32>
    tpu.vector_store %arg3[%c0_4, %c0_5, %c0_6, %c0_7], %13 {strides = array<i32>} : memref<1x3x8x128xf32, #tpu.memory_space<vmem>>, vector<1x1x8x128xf32>,
    %cst_8 = arith.constant dense<0.000000e+00> : vector<8x128xf32>
    %14 = vector.multi_reduction <add>, %7, %cst_8 [0] : vector<2x8x128xf32> to vector<8x128xf32>
    %c0_9 = arith.constant 0 : index
    %c1 = arith.constant 1 : index
    %c0_10 = arith.constant 0 : index
    %c0_11 = arith.constant 0 : index
    %15 = vector.load %arg3[%c0_9, %c1, %c0_10, %c0_11] : memref<1x3x8x128xf32, #tpu.memory_space<vmem>>, vector<1x1x8x128xf32>
    %16 = vector.shape_cast %15 : vector<1x1x8x128xf32> to vector<8x128xf32>
    %17 = vector.shape_cast %14 : vector<8x128xf32> to vector<1x1x8x128xf32>
    tpu.vector_store %arg3[%c0_9, %c1, %c0_10, %c0_11], %17 {strides = array<i32>} : memref<1x3x8x128xf32, #tpu.memory_space<vmem>>, vector<1x1x8x128xf32>,
    %cst_12 = arith.constant dense<0.000000e+00> : vector<8x128xf32>
    %18 = vector.multi_reduction <add>, %8, %cst_12 [0] : vector<2x8x128xf32> to vector<8x128xf32>
    %c0_13 = arith.constant 0 : index
    %c2 = arith.constant 2 : index
    %c0_14 = arith.constant 0 : index
    %c0_15 = arith.constant 0 : index
    %19 = vector.load %arg3[%c0_13, %c2, %c0_14, %c0_15] : memref<1x3x8x128xf32, #tpu.memory_space<vmem>>, vector<1x1x8x128xf32>
    %20 = vector.shape_cast %19 : vector<1x1x8x128xf32> to vector<8x128xf32>
    %21 = vector.shape_cast %18 : vector<8x128xf32> to vector<1x1x8x128xf32>
    tpu.vector_store %arg3[%c0_13, %c2, %c0_14, %c0_15], %21 {strides = array<i32>} : memref<1x3x8x128xf32, #tpu.memory_space<vmem>>, vector<1x1x8x128xf32>,
    return
  }
  func.func @transform_0(%arg0: i32) -> (i32, i32) {
    %c0_i32 = arith.constant 0 : i32
    %c0_i32_0 = arith.constant 0 : i32
    return %arg0, %c0_i32 : i32, i32
  }
  func.func @transform_1(%arg0: i32) -> (i32, i32) {
    %c0_i32 = arith.constant 0 : i32
    %c0_i32_0 = arith.constant 0 : i32
    return %arg0, %c0_i32 : i32, i32
  }
  func.func @transform_2(%arg0: i32) -> (i32, i32, i32, i32) {
    %c0_i32 = arith.constant 0 : i32
    %c0_i32_0 = arith.constant 0 : i32
    %c0_i32_1 = arith.constant 0 : i32
    %c0_i32_2 = arith.constant 0 : i32
    return %arg0, %c0_i32, %c0_i32_0, %c0_i32_1 : i32, i32, i32, i32
  }
}

</mosaic_0001>

<bundles_post_ra>
// kernel: tpu_custom_call.1
= control target key start
LH: loop header
LB: loop body
LE: loop exit
PB: predicated region body
PF: predicated region fallthrough
CT: control target
= control target key end

     0   :  { %7 = vsyncpa [#allocation3], 0  ;;  %s236_s0 = inlined_call_operand.hbm [shape: f32[16,128], index: 0, kind: input, shape index: {}]   ;;  %s237_s1 = inlined_call_operand.hbm [shape: f32[16,128], index: 1, kind: input, shape index: {}]   ;;  %s238_s2 = inlined_call_operand.hbm [shape: f32[1,3,8,128], index: 2, kind: output, shape index: {}]  }
   0x1   :  { %8 = vsyncpa [#allocation6], 0 }
   0x2   :  { %9 = vsyncpa [#allocation4], 0  ;;  %s171_s9 = smov [#allocation2]   ;;  %s99_s13 = scalar_lea.hbm %s236_s0, 256 }
   0x3   :  { %s15_s10 = sshll.u32 %s171_s9, 4  ;;  %p100_p0 = scmp.ne.s32.totalorder %s236_s0, %s99_s13  ;;  %s16_s10 = int_to_ptr.vmem [resolvable:$true] %s15_s10 }
   0x4   :  { %p103_p1 = scmp.lt.u32.totalorder %s99_s13, %s236_s0 }
   0x6   :  { %p105_p2 = pnand %p103_p1, %p100_p0 }
   0x8   :  { %108 = shalt.err (!%p105_p2)
}
   0x9   :  { %s109_s18 = scalar_lea.vmem %s16_s10, 256  ;;  %p114_p4 = scmp.lt.s32.totalorder %s16_s10, %s16_s10 }
   0xa   :  { %p110_p3 = scmp.ne.s32.totalorder %s16_s10, %s109_s18  ;;  %p115_p5 = scmp.lt.s32.totalorder %s109_s18, %s109_s18 }
   0xc   :  { %p116_p6 = por %p115_p5, %p114_p4 }
   0xe   :  { %p117_p7 = pnand %p116_p6, %p110_p3 }
  0x10   :  { %120 = shalt.err (!%p117_p7)
}
  0x11   :  { %s172_s19 = smov 128   ;;  %s173_s20 = smov 8  }
  0x12   :  { %21 = dma.hbm_to_vmem [thread:$0]  %s236_s0, 256, %s16_s10, [#allocation3], %s172_s19, %s172_s19, %s173_s20  }
  0x13   :  { %s174_s23 = smov [#allocation5]   ;;  %s121_s27 = scalar_lea.hbm %s237_s1, 256 }
  0x14   :  { %s27_s24 = sshll.u32 %s174_s23, 4  ;;  %p122_p8 = scmp.ne.s32.totalorder %s237_s1, %s121_s27  ;;  %s28_s24 = int_to_ptr.vmem [resolvable:$true] %s27_s24 }
  0x15   :  { %p125_p9 = scmp.lt.u32.totalorder %s121_s27, %s237_s1 }
  0x17   :  { %p127_p10 = pnand %p125_p9, %p122_p8 }
  0x19   :  { %130 = shalt.err (!%p127_p10)
}
  0x1a   :  { %s131_s4 = scalar_lea.vmem %s28_s24, 256  ;;  %p136_p12 = scmp.lt.s32.totalorder %s28_s24, %s28_s24 }
  0x1b   :  { %p132_p11 = scmp.ne.s32.totalorder %s28_s24, %s131_s4  ;;  %p137_p13 = scmp.lt.s32.totalorder %s131_s4, %s131_s4 }
  0x1d   :  { %p138_p0 = por %p137_p13, %p136_p12 }
  0x1f   :  { %p139_p1 = pnand %p138_p0, %p132_p11 }
  0x21   :  { %142 = shalt.err (!%p139_p1)
}
  0x22   :  { %33 = dma.hbm_to_vmem [thread:$0]  %s237_s1, 256, %s28_s24, [#allocation6], %s172_s19, %s172_s19, %s173_s20  }
  0x23   :  { %165 = dma.done.wait [#allocation3], 256  }
  0x24   :  { %166 = vsyncadd [#allocation3], 4294967040 }
  0x25   :  { %167 = dma.done.wait [#allocation6], 256  }
  0x26   :  { %168 = vsyncadd [#allocation6], 4294967040  ;;  %v40_v0 = vld [vmem:[#allocation2] sm:$0xff]  ;;  %v41_v1 = vld [vmem:[#allocation2 + $0x8] sm:$0xff]  ;;  %s175_s1 = smov [#allocation7]  }
  0x27   :  { %v42_v2 = vld [vmem:[#allocation5] sm:$0xff]  ;;  %v43_v3 = vld [vmem:[#allocation5 + $0x8] sm:$0xff]  ;;  %v84_v4 = vmul.f32 -1.442695, %v40_v0  ;;  %v85_v5 = vmul.f32 -1.442695, %v41_v1 }
  0x28   :  { %v63_v6 = vadd.f32 %v43_v3, %v42_v2  ;;  %s71_s6 = sshll.u32 %s175_s1, 4  ;;  %s72_s6 = int_to_ptr.vmem [resolvable:$true] %s71_s6 }
  0x29   :  { %91 = vpow2.f32 %v84_v4  ;;  %s143_s7 = scalar_lea.vmem %s72_s6, 384  ;;  %p148_p3 = scmp.lt.s32.totalorder %s72_s6, %s72_s6 }
  0x2a   :  { %93 = vpow2.f32 %v85_v5  ;;  %65 = vst [vmem:[#allocation7 + $0x10] sm:$0xff] %v63_v6  ;;  %p144_p2 = scmp.ne.s32.totalorder %s72_s6, %s143_s7  ;;  %p149_p4 = scmp.lt.s32.totalorder %s143_s7, %s143_s7 }
  0x2c   :  { %p150_p5 = por %p149_p4, %p148_p3 }
  0x2e   :  { %p151_p6 = pnand %p150_p5, %p144_p2 }
  0x33   :  { %v92_v7 = vpop.eup %91 }
  0x34   :  { %v94_v8 = vpop.eup %93  ;;  %v50_v9 = vadd.f32 1.0, %v92_v7 }
  0x35   :  { %v51_v10 = vadd.f32 1.0, %v94_v8 }
  0x36   :  { %95 = vrcp.f32 %v50_v9 }
  0x37   :  { %97 = vrcp.f32 %v51_v10 }
  0x40   :  { %v96_v11 = vpop.eup %95 }
  0x41   :  { %v98_v12 = vpop.eup %97  ;;  %v56_v13 = vmul.f32 %v96_v11, %v42_v2 }
  0x42   :  { %v57_v14 = vmul.f32 %v98_v12, %v43_v3  ;;  %v60_v15 = vadd.f32 %v98_v12, %v96_v11 }
  0x44   :  { %v58_v16 = vadd.f32 %v57_v14, %v56_v13  ;;  %62 = vst [vmem:[#allocation7 + $0x8] sm:$0xff] %v60_v15 }
  0x46   :  { %59 = vst [vmem:[#allocation7] sm:$0xff] %v58_v16 }
  0x47   :  { %154 = shalt.err (!%p151_p6)
}
  0x48   :  { %s155_s10 = scalar_lea.hbm %s238_s2, 384 }
  0x49   :  { %p156_p7 = scmp.ne.s32.totalorder %s238_s2, %s155_s10  ;;  %p159_p8 = scmp.lt.u32.totalorder %s155_s10, %s238_s2 }
  0x4b   :  { %p161_p9 = pnand %p159_p8, %p156_p7 }
  0x4d   :  { %164 = shalt.err (!%p161_p9)
}
  0x4e   :  { %77 = dma.vmem_to_hbm [thread:$0]  %s72_s6, 384, %s238_s2, [#allocation4], %s172_s19, %s172_s19, %s173_s20  }
  0x4f   :  { %169 = dma.done.wait [#allocation4], 384  }
  0x50   :  { %170 = vsyncadd [#allocation4], 4294966912 }
  0x51   :  { %81 = vsyncpa [#allocation3], 1 }
  0x52   :  { %82 = vsyncpa [#allocation6], 1 }
  0x53   :  { %83 = vsyncpa [#allocation4], 1 }

</bundles_post_ra>
